<compile_context>
chip_gen: v7x
topology: tpu7x:2x2x1
jax: 0.10.0
libtpu: 0.0.40
codegen_flags: <defaults>
</compile_context>

<pallas_src>
import functools

import jax
import jax.numpy as jnp
from jax.experimental import pallas as pl
from jax.experimental.pallas import tpu as pltpu


def _vq_tile_kernel(x_ref, e_ref, esq_ref, *out_refs,
                    emit_distances, dist_dtype, m_valid, tile_m):
    """One TILE_M-row tile of the VQ forward."""
    if emit_distances:
        dist_ref, idx_ref, quant_ref, stats_ref = out_refs
    else:
        idx_ref, quant_ref, stats_ref = out_refs

    x = x_ref[...]                          # (TM, D) f32 tile of flat latents
    e = e_ref[...]                          # (K, D)  f32 codebook (resident)
    TM, D = x.shape
    K = e.shape[0]

    # x @ E^T on the MXU in its native bf16 width, f32 accumulation.
    xe = jax.lax.dot_general(
        x.astype(jnp.bfloat16), e.astype(jnp.bfloat16),
        dimension_numbers=(((1,), (1,)), ((), ())),
        preferred_element_type=jnp.float32)                       # (TM, K)

    # argmin only needs ||e||^2 - 2 x.e (||x||^2 is constant per row).
    score = esq_ref[...] - 2.0 * xe                               # (TM, K)

    # argmin over K with first-occurrence tie-break via iota/min (VPU/XLU).
    col = jax.lax.broadcasted_iota(jnp.int32, (TM, K), 1)
    smin = jnp.min(score, axis=1, keepdims=True)                  # (TM, 1)
    idx = jnp.min(jnp.where(score == smin, col, jnp.int32(K)),
                  axis=1, keepdims=True)                          # (TM, 1)
    idx_ref[...] = idx

    enc = (col == idx).astype(jnp.float32)                        # one-hot

    # Exact codeword selection: this matmul stays f32 so `quantized` matches
    # the codebook (enc is one-hot; bf16 here would round the codewords).
    q = jnp.dot(enc, e, preferred_element_type=jnp.float32)       # (TM, D)
    quant_ref[...] = q

    if emit_distances:
        x_sq = jnp.sum(x * x, axis=1, keepdims=True)              # (TM, 1) XLU
        dist_ref[...] = (score + x_sq).astype(dist_dtype)

    # Tail-row mask (only generated when M was padded to a tile multiple).
    diff = q - x
    enc_src = enc
    if m_valid is not None:
        row = jax.lax.broadcasted_iota(jnp.int32, (TM, 1), 0)
        valid = ((row + pl.program_id(0) * tile_m) < m_valid)
        valid = valid.astype(jnp.float32)                         # (TM, 1)
        diff = diff * valid
        enc_src = enc * valid

    # Per-tile partial statistics, packed in one lane-dense (8, K) block:
    #   row 0: per-code column sums of the (masked) one-hot encodings
    #   row 1: sum((q - x)^2) broadcast across lanes (wrapper reads [1, 0])
    sq = jnp.sum(diff * diff)
    colsum = jnp.sum(enc_src, axis=0, keepdims=True)              # (1, K) XLU
    rowi = jax.lax.broadcasted_iota(jnp.int32, (8, K), 0)
    stats = jnp.where(rowi == 0, jnp.broadcast_to(colsum, (8, K)),
                      jnp.where(rowi == 1, sq, 0.0))
    stats_ref[...] = stats


def _round_up(a, b):
    return (a + b - 1) // b * b


def _vmem_capacity_bytes():
    try:
        return int(pltpu.get_tpu_info().vmem_capacity_bytes)
    except Exception:                       # best-effort hardware query
        return 64 << 20                     # conservative: v7x per-core VMEM


def _tile_vmem_bytes(tm, k, d, dist_bytes):
    """Estimated VMEM footprint of the pipelined working set at tile size tm."""
    dp = _round_up(d, 128)                  # lane padding of the (8,128) layout
    kp = _round_up(k, 128)
    per_tile = 2 * tm * dp * 4              # x input + quant output tiles
    per_tile += tm * 128 * 4                # int32 index column (lane padded)
    per_tile += 8 * kp * 4                  # stats block
    if dist_bytes:
        per_tile += tm * kp * dist_bytes    # distances output tile
    resident = _round_up(k, 8) * dp * 4 + 8 * kp * 4   # codebook + ||E||^2 (1 buf)
    return 2 * per_tile + resident          # x2: double-buffered pipeline


def _pick_tile_m(m, k, d, preferred, dist_bytes, budget):
    """Largest multiple-of-8 tile <= preferred whose working set fits `budget`."""
    tm = max(8, min(_round_up(preferred, 8), _round_up(m, 8)))
    tm -= tm % 8
    while tm > 8 and _tile_vmem_bytes(tm, k, d, dist_bytes) > budget:
        half = tm // 2
        tm = max(8, half - (half % 8))
    return tm


def vector_quantize_ema_forward(x, embedding_weight, commit_cost=0.25,
                                preferred_tile_m=2048,
                                return_distances=True,
                                distances_dtype=jnp.float32):
    """Forward pass of VectorQuantizeEMA (inference semantics).

    x: (b, n, j, d) array with d == embedding_dim
    embedding_weight: (num_embeddings, embedding_dim)
    """
    b, n, j, d = x.shape
    K, D = embedding_weight.shape
    assert d == D, "last input axis must equal embedding_dim"

    # 'b n j d -> b j d n' then row-major flatten to (M, D), like the
    # reference .view().  This pre-transpose is a standalone XLA HBM copy; one
    # flattened row mixes the d and n axes, so it is not expressible as a
    # rectangular BlockSpec.
    # TODO(synk): fold the layout reorg into the kernel's DMA pattern
    # (grid over (b, j) + in-kernel relayout) to drop the two XLA transposes.
    lat = jnp.transpose(x, (0, 2, 3, 1)).astype(jnp.float32)      # (b, j, d, n)
    x_flat = lat.reshape(-1, D)
    M = x_flat.shape[0]

    e = embedding_weight.astype(jnp.float32)
    # Hoisted codebook norms: computed once per call, (1, K) constant block.
    e_sq = jnp.sum(e * e, axis=1)[None, :]

    dist_bytes = jnp.dtype(distances_dtype).itemsize if return_distances else 0
    cap = _vmem_capacity_bytes()
    budget = min(int(cap * 0.7), cap - (12 << 20))                # ~45 MiB on v7x
    tm = _pick_tile_m(M, K, D, preferred_tile_m, dist_bytes, budget)

    M_pad = _round_up(M, tm)
    num_tiles = M_pad // tm            # NOTE(v7x): >=2 tiles lets megacore split
    if M_pad != M:
        x_pad = jnp.pad(x_flat, ((0, M_pad - M), (0, 0)))
        m_valid = M                    # mask padded tail rows inside the kernel
    else:
        x_pad = x_flat
        m_valid = None

    est = _tile_vmem_bytes(tm, K, D, dist_bytes)
    vmem_limit = int(min(cap - (8 << 20), max(32 << 20, est + (8 << 20))))

    def run(single_buffer_constants):
        const_kw = ({"pipeline_mode": pl.Buffered(1)}
                    if single_buffer_constants else {})
        in_specs = [
            pl.BlockSpec((tm, D), lambda i: (i, 0)),
            pl.BlockSpec((K, D), lambda i: (0, 0), **const_kw),   # codebook
            pl.BlockSpec((1, K), lambda i: (0, 0), **const_kw),   # ||E||^2
        ]
        out_shape = []
        out_specs = []
        if return_distances:
            out_shape.append(jax.ShapeDtypeStruct((M_pad, K), distances_dtype))
            out_specs.append(pl.BlockSpec((tm, K), lambda i: (i, 0)))
        out_shape += [
            jax.ShapeDtypeStruct((M_pad, 1), jnp.int32),           # argmin idx
            jax.ShapeDtypeStruct((M_pad, D), jnp.float32),         # quantized
            jax.ShapeDtypeStruct((num_tiles * 8, K), jnp.float32),  # stats
        ]
        out_specs += [
            pl.BlockSpec((tm, 1), lambda i: (i, 0)),
            pl.BlockSpec((tm, D), lambda i: (i, 0)),
            pl.BlockSpec((8, K), lambda i: (i, 0)),
        ]
        kernel = functools.partial(
            _vq_tile_kernel, emit_distances=return_distances,
            dist_dtype=distances_dtype, m_valid=m_valid, tile_m=tm)
        return pl.pallas_call(
            kernel,
            grid=(num_tiles,),
            out_shape=tuple(out_shape),
            in_specs=in_specs,
            out_specs=tuple(out_specs),
            compiler_params=pltpu.CompilerParams(
                dimension_semantics=("parallel",),   # megacore-shardable on v7x
                vmem_limit_bytes=vmem_limit),
        )(x_pad, e, e_sq)

    try:
        outs = run(True)
    except Exception:
        # Fallback for builds that reject single-buffered (pl.Buffered(1)) specs.
        outs = run(False)

    if return_distances:
        dist_pad, idx_pad, quant_pad, stats = outs
        distances = dist_pad[:M]
    else:
        idx_pad, quant_pad, stats = outs
        distances = None

    indices = idx_pad[:M, 0]

    # Tiny cross-tile reductions finish in the wrapper (keeps the grid axis
    # fully parallel; (num_tiles, 8, K) is negligible HBM traffic).
    stats = stats.reshape(num_tiles, 8, K)
    counts = jnp.sum(stats[:, 0, :], axis=0)           # per-code usage (K,)
    sq_err = jnp.sum(stats[:, 1, 0])                   # total sum((q - x)^2)
    loss = commit_cost * sq_err / (M * D)
    avg_probs = counts / M
    perplexity = jnp.exp(-jnp.sum(avg_probs * jnp.log(avg_probs + 1e-10)))

    # f32 one-hot only materialised here (and DCE'd under jit when unused).
    encodings = jax.nn.one_hot(indices, K, dtype=jnp.float32)

    # Straight-through estimator and layout restore: 'b j d n -> b n j d'.
    q = quant_pad[:M].reshape(lat.shape)
    q_st = lat + jax.lax.stop_gradient(q - lat)
    quantized = jnp.transpose(q_st, (0, 3, 1, 2)).astype(x.dtype)

    # TODO(synk): training-mode EMA codebook update (ema_cluster_size /
    # ema_weight nn.Parameter mutation) is stateful and does not affect the
    # forward outputs; `counts` equals sum(encodings, 0) if a caller wants to
    # apply the EMA update outside.

    return {
        "quantized": quantized,
        "loss": loss,
        "perplexity": perplexity,
        "encodings": encodings,
        "encoding_indices": indices,   # extra: compact int32 codes
        "distances": distances,
    }


def _reference_forward(x, embedding_weight, commit_cost=0.25):
    """Plain-JAX mirror of the PyTorch forward (the x.E cross-term uses the
    same bf16 MXU precision as the kernel; everything else is f32)."""
    b, n, j, d = x.shape
    K, D = embedding_weight.shape
    lat = jnp.transpose(x, (0, 2, 3, 1)).astype(jnp.float32)
    xf = lat.reshape(-1, D)
    e = embedding_weight.astype(jnp.float32)
    xe = jnp.dot(xf.astype(jnp.bfloat16), e.astype(jnp.bfloat16).T,
                 preferred_element_type=jnp.float32)
    dist = (jnp.sum(xf ** 2, axis=1, keepdims=True)
            + jnp.sum(e ** 2, axis=1) - 2.0 * xe)
    idx = jnp.argmin(dist, axis=1)
    enc = jax.nn.one_hot(idx, K, dtype=jnp.float32)
    q = e[idx].reshape(lat.shape)
    loss = commit_cost * jnp.mean((q - lat) ** 2)
    avg = jnp.mean(enc, axis=0)
    perp = jnp.exp(-jnp.sum(avg * jnp.log(avg + 1e-10)))
    quantized = jnp.transpose(q, (0, 3, 1, 2))
    return quantized, loss, perp, enc, dist


if __name__ == "__main__":
    # Small, deterministic example consistent with the module:
    # num_embeddings=128, embedding_dim=64, input (batch=2, n=8, j=2, d=64).
    num_embeddings, embedding_dim = 128, 64
    b, n, j, d = 2, 8, 2, embedding_dim

    key = jax.random.PRNGKey(0)
    k_x, k_emb = jax.random.split(key)
    x = jax.random.normal(k_x, (b, n, j, d), dtype=jnp.float32)
    embedding_weight = jax.random.normal(
        k_emb, (num_embeddings, embedding_dim), dtype=jnp.float32)

    q_ref, loss_ref, perp_ref, enc_ref, dist_ref = _reference_forward(
        x, embedding_weight, commit_cost=0.25)
    M = b * n * j

    # Run 1: defaults (single tile covers all rows, f32 distances).
    out = vector_quantize_ema_forward(x, embedding_weight, commit_cost=0.25)
    out = jax.block_until_ready(out)
    assert out["quantized"].shape == (b, n, j, d)
    assert out["encodings"].shape == (M, num_embeddings)
    assert out["distances"].shape == (M, num_embeddings)
    assert jnp.allclose(out["quantized"], q_ref, atol=1e-4, rtol=1e-4)
    assert jnp.allclose(out["encodings"], enc_ref)
    assert jnp.allclose(out["distances"], dist_ref, atol=1e-2, rtol=1e-3)
    assert jnp.allclose(out["loss"], loss_ref, atol=1e-4, rtol=1e-4)
    assert jnp.allclose(out["perplexity"], perp_ref, atol=1e-3, rtol=1e-3)

    # Run 2: force multiple tiles + tail padding/masking + bf16 distance store.
    out2 = vector_quantize_ema_forward(
        x, embedding_weight, commit_cost=0.25, preferred_tile_m=24,
        distances_dtype=jnp.bfloat16)
    out2 = jax.block_until_ready(out2)
    assert jnp.allclose(out2["quantized"], q_ref, atol=1e-4, rtol=1e-4)
    assert jnp.allclose(out2["encodings"], enc_ref)
    assert jnp.allclose(out2["distances"].astype(jnp.float32), dist_ref,
                        atol=1.0, rtol=1e-2)
    assert jnp.allclose(out2["loss"], loss_ref, atol=1e-4, rtol=1e-4)
    assert jnp.allclose(out2["perplexity"], perp_ref, atol=1e-3, rtol=1e-3)

    print("KERNEL_OK")
</pallas_src>

<mosaic_0001>
module attributes {stable_mosaic.version = 11 : i64} {
  func.func @_vq_tile_kernel(%arg0: i32, %arg1: memref<32x64xf32, #tpu.memory_space<vmem>>, %arg2: memref<128x64xf32, #tpu.memory_space<vmem>>, %arg3: memref<1x128xf32, #tpu.memory_space<vmem>>, %arg4: memref<32x128xf32, #tpu.memory_space<vmem>>, %arg5: memref<32x1xi32, #tpu.memory_space<vmem>>, %arg6: memref<32x64xf32, #tpu.memory_space<vmem>>, %arg7: memref<8x128xf32, #tpu.memory_space<vmem>>) attributes {dimension_semantics = [#tpu.dimension_semantics<parallel>], iteration_bounds = array<i64: 1>, scalar_prefetch = 0 : i64, scratch_operands = 0 : i64, tpu.core_type = #tpu.core_type<tc>, window_params = [{transform_indices = @transform_0, window_bounds = array<i64: 32, 64>}, {pipeline_mode = #tpu.pipeline_mode<synchronous>, transform_indices = @transform_1, window_bounds = array<i64: 128, 64>}, {pipeline_mode = #tpu.pipeline_mode<synchronous>, transform_indices = @transform_2, window_bounds = array<i64: 1, 128>}, {transform_indices = @transform_3, window_bounds = array<i64: 32, 128>}, {transform_indices = @transform_4, window_bounds = array<i64: 32, 1>}, {transform_indices = @transform_5, window_bounds = array<i64: 32, 64>}, {transform_indices = @transform_6, window_bounds = array<i64: 8, 128>}]} {
    %c0 = arith.constant 0 : index
    %c0_0 = arith.constant 0 : index
    %0 = vector.load %arg1[%c0, %c0_0] : memref<32x64xf32, #tpu.memory_space<vmem>>, vector<32x64xf32>
    %c0_1 = arith.constant 0 : index
    %c0_2 = arith.constant 0 : index
    %1 = vector.load %arg2[%c0_1, %c0_2] : memref<128x64xf32, #tpu.memory_space<vmem>>, vector<128x64xf32>
    %2 = arith.truncf %0 : vector<32x64xf32> to vector<32x64xbf16>
    %3 = arith.truncf %1 : vector<128x64xf32> to vector<128x64xbf16>
    %cst = arith.constant dense<0.000000e+00> : vector<32x128xf32>
    %4 = tpu.matmul %2, %3, %cst {dimension_numbers = #tpu.dot_dimension_numbers<[1], [1], [0], [0], [0, 0, 1, 0], [], []>} : vector<32x64xbf16>, vector<128x64xbf16>, vector<32x128xf32> -> vector<32x128xf32>
    %c0_3 = arith.constant 0 : index
    %c0_4 = arith.constant 0 : index
    %5 = vector.load %arg3[%c0_3, %c0_4] : memref<1x128xf32, #tpu.memory_space<vmem>>, vector<1x128xf32>
    %cst_5 = arith.constant 2.000000e+00 : f32
    %6 = vector.broadcast %cst_5 : f32 to vector<32x128xf32>
    %7 = arith.mulf %6, %4 : vector<32x128xf32>
    %8 = vector.broadcast %5 : vector<1x128xf32> to vector<32x128xf32>
    %9 = arith.subf %8, %7 : vector<32x128xf32>
    %10 = tpu.iota {dimensions = array<i32: 1>} : vector<32x128xi32>
    %cst_6 = arith.constant dense<0x7F800000> : vector<32xf32>
    %11 = vector.multi_reduction <minimumf>, %9, %cst_6 [1] : vector<32x128xf32> to vector<32xf32>
    %12 = vector.shape_cast %11 : vector<32xf32> to vector<32x1xf32>
    %13 = vector.broadcast %12 : vector<32x1xf32> to vector<32x128xf32>
    %14 = arith.cmpf oeq, %9, %13 : vector<32x128xf32>
    %c128_i32 = arith.constant 128 : i32
    %15 = vector.broadcast %c128_i32 : i32 to vector<32x128xi32>
    %16 = arith.select %14, %10, %15 : vector<32x128xi1>, vector<32x128xi32>
    %cst_7 = arith.constant dense<2147483647> : vector<32xi32>
    %17 = vector.multi_reduction <minsi>, %16, %cst_7 [1] : vector<32x128xi32> to vector<32xi32>
    %18 = vector.shape_cast %17 : vector<32xi32> to vector<32x1xi32>
    %c0_8 = arith.constant 0 : index
    %c0_9 = arith.constant 0 : index
    %19 = vector.load %arg5[%c0_8, %c0_9] : memref<32x1xi32, #tpu.memory_space<vmem>>, vector<32x1xi32>
    tpu.vector_store %arg5[%c0_8, %c0_9], %18 {strides = array<i32>} : memref<32x1xi32, #tpu.memory_space<vmem>>, vector<32x1xi32>,
    %20 = vector.broadcast %18 : vector<32x1xi32> to vector<32x128xi32>
    %21 = arith.cmpi eq, %10, %20 : vector<32x128xi32>
    %22 = arith.extui %21 : vector<32x128xi1> to vector<32x128xi32>
    %23 = arith.sitofp %22 : vector<32x128xi32> to vector<32x128xf32>
    %cst_10 = arith.constant dense<0.000000e+00> : vector<32x64xf32>
    %24 = tpu.matmul %23, %1, %cst_10 {dimension_numbers = #tpu.dot_dimension_numbers<[1], [0], [0], [1], [0, 0, 1, 1], [], []>} : vector<32x128xf32>, vector<128x64xf32>, vector<32x64xf32> -> vector<32x64xf32>
    %c0_11 = arith.constant 0 : index
    %c0_12 = arith.constant 0 : index
    %25 = vector.load %arg6[%c0_11, %c0_12] : memref<32x64xf32, #tpu.memory_space<vmem>>, vector<32x64xf32>
    tpu.vector_store %arg6[%c0_11, %c0_12], %24 {strides = array<i32>} : memref<32x64xf32, #tpu.memory_space<vmem>>, vector<32x64xf32>,
    %26 = arith.mulf %0, %0 : vector<32x64xf32>
    %cst_13 = arith.constant dense<0.000000e+00> : vector<32xf32>
    %27 = vector.multi_reduction <add>, %26, %cst_13 [1] : vector<32x64xf32> to vector<32xf32>
    %28 = vector.shape_cast %27 : vector<32xf32> to vector<32x1xf32>
    %29 = vector.broadcast %28 : vector<32x1xf32> to vector<32x128xf32>
    %30 = arith.addf %9, %29 : vector<32x128xf32>
    %c0_14 = arith.constant 0 : index
    %c0_15 = arith.constant 0 : index
    %31 = vector.load %arg4[%c0_14, %c0_15] : memref<32x128xf32, #tpu.memory_space<vmem>>, vector<32x128xf32>
    tpu.vector_store %arg4[%c0_14, %c0_15], %30 {strides = array<i32>} : memref<32x128xf32, #tpu.memory_space<vmem>>, vector<32x128xf32>,
    %32 = arith.subf %24, %0 : vector<32x64xf32>
    %33 = arith.mulf %32, %32 : vector<32x64xf32>
    %34 = vector.shape_cast %33 : vector<32x64xf32> to vector<1x32x64xf32>
    %cst_16 = arith.constant dense<0.000000e+00> : vector<1xf32>
    %35 = vector.multi_reduction <add>, %34, %cst_16 [1, 2] : vector<1x32x64xf32> to vector<1xf32>
    %36 = vector.shape_cast %35 : vector<1xf32> to vector<1x1x1xf32>
    %37 = vector.extract %36[0, 0, 0] : f32 from vector<1x1x1xf32>
    %cst_17 = arith.constant dense<0.000000e+00> : vector<128xf32>
    %38 = vector.multi_reduction <add>, %23, %cst_17 [0] : vector<32x128xf32> to vector<128xf32>
    %39 = vector.shape_cast %38 : vector<128xf32> to vector<1x128xf32>
    %40 = tpu.iota {dimensions = array<i32: 0>} : vector<8x128xi32>
    %c0_i32 = arith.constant 0 : i32
    %41 = vector.broadcast %c0_i32 : i32 to vector<8x128xi32>
    %42 = arith.cmpi eq, %40, %41 : vector<8x128xi32>
    %43 = vector.shape_cast %39 : vector<1x128xf32> to vector<1x128xf32>
    %44 = vector.broadcast %43 : vector<1x128xf32> to vector<8x128xf32>
    %c1_i32 = arith.constant 1 : i32
    %45 = vector.broadcast %c1_i32 : i32 to vector<8x128xi32>
    %46 = arith.cmpi eq, %40, %45 : vector<8x128xi32>
    %cst_18 = arith.constant 0.000000e+00 : f32
    %47 = vector.broadcast %37 : f32 to vector<8x128xf32>
    %48 = vector.broadcast %cst_18 : f32 to vector<8x128xf32>
    %49 = arith.select %46, %47, %48 : vector<8x128xi1>, vector<8x128xf32>
    %50 = arith.select %42, %44, %49 : vector<8x128xi1>, vector<8x128xf32>
    %c0_19 = arith.constant 0 : index
    %c0_20 = arith.constant 0 : index
    %51 = vector.load %arg7[%c0_19, %c0_20] : memref<8x128xf32, #tpu.memory_space<vmem>>, vector<8x128xf32>
    tpu.vector_store %arg7[%c0_19, %c0_20], %50 {strides = array<i32>} : memref<8x128xf32, #tpu.memory_space<vmem>>, vector<8x128xf32>,
    return
  }
  func.func @transform_0(%arg0: i32) -> (i32, i32) {
    %c0_i32 = arith.constant 0 : i32
    %c0_i32_0 = arith.constant 0 : i32
    return %arg0, %c0_i32 : i32, i32
  }
  func.func @transform_1(%arg0: i32) -> (i32, i32) {
    %c0_i32 = arith.constant 0 : i32
    %c0_i32_0 = arith.constant 0 : i32
    %c0_i32_1 = arith.constant 0 : i32
    return %c0_i32, %c0_i32_0 : i32, i32
  }
  func.func @transform_2(%arg0: i32) -> (i32, i32) {
    %c0_i32 = arith.constant 0 : i32
    %c0_i32_0 = arith.constant 0 : i32
    %c0_i32_1 = arith.constant 0 : i32
    return %c0_i32, %c0_i32_0 : i32, i32
  }
  func.func @transform_3(%arg0: i32) -> (i32, i32) {
    %c0_i32 = arith.constant 0 : i32
    %c0_i32_0 = arith.constant 0 : i32
    return %arg0, %c0_i32 : i32, i32
  }
  func.func @transform_4(%arg0: i32) -> (i32, i32) {
    %c0_i32 = arith.constant 0 : i32
    %c0_i32_0 = arith.constant 0 : i32
    return %arg0, %c0_i32 : i32, i32
  }
  func.func @transform_5(%arg0: i32) -> (i32, i32) {
    %c0_i32 = arith.constant 0 : i32
    %c0_i32_0 = arith.constant 0 : i32
    return %arg0, %c0_i32 : i32, i32
  }
  func.func @transform_6(%arg0: i32) -> (i32, i32) {
    %c0_i32 = arith.constant 0 : i32
    %c0_i32_0 = arith.constant 0 : i32
    return %arg0, %c0_i32 : i32, i32
  }
}

module attributes {stable_mosaic.version = 11 : i64} {
  func.func @_vq_tile_kernel(%arg0: i32, %arg1: memref<32x64xf32, #tpu.memory_space<vmem>>, %arg2: memref<128x64xf32, #tpu.memory_space<vmem>>, %arg3: memref<1x128xf32, #tpu.memory_space<vmem>>, %arg4: memref<32x128xf32, #tpu.memory_space<vmem>>, %arg5: memref<32x1xi32, #tpu.memory_space<vmem>>, %arg6: memref<32x64xf32, #tpu.memory_space<vmem>>, %arg7: memref<8x128xf32, #tpu.memory_space<vmem>>) attributes {dimension_semantics = [#tpu.dimension_semantics<parallel>], iteration_bounds = array<i64: 1>, scalar_prefetch = 0 : i64, scratch_operands = 0 : i64, tpu.core_type = #tpu.core_type<tc>, window_params = [{transform_indices = @transform_0, window_bounds = array<i64: 32, 64>}, {pipeline_mode = #tpu.pipeline_mode<synchronous>, transform_indices = @transform_1, window_bounds = array<i64: 128, 64>}, {pipeline_mode = #tpu.pipeline_mode<synchronous>, transform_indices = @transform_2, window_bounds = array<i64: 1, 128>}, {transform_indices = @transform_3, window_bounds = array<i64: 32, 128>}, {transform_indices = @transform_4, window_bounds = array<i64: 32, 1>}, {transform_indices = @transform_5, window_bounds = array<i64: 32, 64>}, {transform_indices = @transform_6, window_bounds = array<i64: 8, 128>}]} {
    %c0 = arith.constant 0 : index
    %c0_0 = arith.constant 0 : index
    %0 = vector.load %arg1[%c0, %c0_0] : memref<32x64xf32, #tpu.memory_space<vmem>>, vector<32x64xf32>
    %c0_1 = arith.constant 0 : index
    %c0_2 = arith.constant 0 : index
    %1 = vector.load %arg2[%c0_1, %c0_2] : memref<128x64xf32, #tpu.memory_space<vmem>>, vector<128x64xf32>
    %2 = arith.truncf %0 : vector<32x64xf32> to vector<32x64xbf16>
    %3 = arith.truncf %1 : vector<128x64xf32> to vector<128x64xbf16>
    %cst = arith.constant dense<0.000000e+00> : vector<32x128xf32>
    %4 = tpu.matmul %2, %3, %cst {dimension_numbers = #tpu.dot_dimension_numbers<[1], [1], [0], [0], [0, 0, 1, 0], [], []>} : vector<32x64xbf16>, vector<128x64xbf16>, vector<32x128xf32> -> vector<32x128xf32>
    %c0_3 = arith.constant 0 : index
    %c0_4 = arith.constant 0 : index
    %5 = vector.load %arg3[%c0_3, %c0_4] : memref<1x128xf32, #tpu.memory_space<vmem>>, vector<1x128xf32>
    %cst_5 = arith.constant 2.000000e+00 : f32
    %6 = vector.broadcast %cst_5 : f32 to vector<32x128xf32>
    %7 = arith.mulf %6, %4 : vector<32x128xf32>
    %8 = vector.broadcast %5 : vector<1x128xf32> to vector<32x128xf32>
    %9 = arith.subf %8, %7 : vector<32x128xf32>
    %10 = tpu.iota {dimensions = array<i32: 1>} : vector<32x128xi32>
    %cst_6 = arith.constant dense<0x7F800000> : vector<32xf32>
    %11 = vector.multi_reduction <minimumf>, %9, %cst_6 [1] : vector<32x128xf32> to vector<32xf32>
    %12 = vector.shape_cast %11 : vector<32xf32> to vector<32x1xf32>
    %13 = vector.broadcast %12 : vector<32x1xf32> to vector<32x128xf32>
    %14 = arith.cmpf oeq, %9, %13 : vector<32x128xf32>
    %c128_i32 = arith.constant 128 : i32
    %15 = vector.broadcast %c128_i32 : i32 to vector<32x128xi32>
    %16 = arith.select %14, %10, %15 : vector<32x128xi1>, vector<32x128xi32>
    %cst_7 = arith.constant dense<2147483647> : vector<32xi32>
    %17 = vector.multi_reduction <minsi>, %16, %cst_7 [1] : vector<32x128xi32> to vector<32xi32>
    %18 = vector.shape_cast %17 : vector<32xi32> to vector<32x1xi32>
    %c0_8 = arith.constant 0 : index
    %c0_9 = arith.constant 0 : index
    %19 = vector.load %arg5[%c0_8, %c0_9] : memref<32x1xi32, #tpu.memory_space<vmem>>, vector<32x1xi32>
    tpu.vector_store %arg5[%c0_8, %c0_9], %18 {strides = array<i32>} : memref<32x1xi32, #tpu.memory_space<vmem>>, vector<32x1xi32>,
    %20 = vector.broadcast %18 : vector<32x1xi32> to vector<32x128xi32>
    %21 = arith.cmpi eq, %10, %20 : vector<32x128xi32>
    %22 = arith.extui %21 : vector<32x128xi1> to vector<32x128xi32>
    %23 = arith.sitofp %22 : vector<32x128xi32> to vector<32x128xf32>
    %cst_10 = arith.constant dense<0.000000e+00> : vector<32x64xf32>
    %24 = tpu.matmul %23, %1, %cst_10 {dimension_numbers = #tpu.dot_dimension_numbers<[1], [0], [0], [1], [0, 0, 1, 1], [], []>} : vector<32x128xf32>, vector<128x64xf32>, vector<32x64xf32> -> vector<32x64xf32>
    %c0_11 = arith.constant 0 : index
    %c0_12 = arith.constant 0 : index
    %25 = vector.load %arg6[%c0_11, %c0_12] : memref<32x64xf32, #tpu.memory_space<vmem>>, vector<32x64xf32>
    tpu.vector_store %arg6[%c0_11, %c0_12], %24 {strides = array<i32>} : memref<32x64xf32, #tpu.memory_space<vmem>>, vector<32x64xf32>,
    %26 = arith.mulf %0, %0 : vector<32x64xf32>
    %cst_13 = arith.constant dense<0.000000e+00> : vector<32xf32>
    %27 = vector.multi_reduction <add>, %26, %cst_13 [1] : vector<32x64xf32> to vector<32xf32>
    %28 = vector.shape_cast %27 : vector<32xf32> to vector<32x1xf32>
    %29 = vector.broadcast %28 : vector<32x1xf32> to vector<32x128xf32>
    %30 = arith.addf %9, %29 : vector<32x128xf32>
    %c0_14 = arith.constant 0 : index
    %c0_15 = arith.constant 0 : index
    %31 = vector.load %arg4[%c0_14, %c0_15] : memref<32x128xf32, #tpu.memory_space<vmem>>, vector<32x128xf32>
    tpu.vector_store %arg4[%c0_14, %c0_15], %30 {strides = array<i32>} : memref<32x128xf32, #tpu.memory_space<vmem>>, vector<32x128xf32>,
    %32 = arith.subf %24, %0 : vector<32x64xf32>
    %33 = arith.mulf %32, %32 : vector<32x64xf32>
    %34 = vector.shape_cast %33 : vector<32x64xf32> to vector<1x32x64xf32>
    %cst_16 = arith.constant dense<0.000000e+00> : vector<1xf32>
    %35 = vector.multi_reduction <add>, %34, %cst_16 [1, 2] : vector<1x32x64xf32> to vector<1xf32>
    %36 = vector.shape_cast %35 : vector<1xf32> to vector<1x1x1xf32>
    %37 = vector.extract %36[0, 0, 0] : f32 from vector<1x1x1xf32>
    %cst_17 = arith.constant dense<0.000000e+00> : vector<128xf32>
    %38 = vector.multi_reduction <add>, %23, %cst_17 [0] : vector<32x128xf32> to vector<128xf32>
    %39 = vector.shape_cast %38 : vector<128xf32> to vector<1x128xf32>
    %40 = tpu.iota {dimensions = array<i32: 0>} : vector<8x128xi32>
    %c0_i32 = arith.constant 0 : i32
    %41 = vector.broadcast %c0_i32 : i32 to vector<8x128xi32>
    %42 = arith.cmpi eq, %40, %41 : vector<8x128xi32>
    %43 = vector.shape_cast %39 : vector<1x128xf32> to vector<1x128xf32>
    %44 = vector.broadcast %43 : vector<1x128xf32> to vector<8x128xf32>
    %c1_i32 = arith.constant 1 : i32
    %45 = vector.broadcast %c1_i32 : i32 to vector<8x128xi32>
    %46 = arith.cmpi eq, %40, %45 : vector<8x128xi32>
    %cst_18 = arith.constant 0.000000e+00 : f32
    %47 = vector.broadcast %37 : f32 to vector<8x128xf32>
    %48 = vector.broadcast %cst_18 : f32 to vector<8x128xf32>
    %49 = arith.select %46, %47, %48 : vector<8x128xi1>, vector<8x128xf32>
    %50 = arith.select %42, %44, %49 : vector<8x128xi1>, vector<8x128xf32>
    %c0_19 = arith.constant 0 : index
    %c0_20 = arith.constant 0 : index
    %51 = vector.load %arg7[%c0_19, %c0_20] : memref<8x128xf32, #tpu.memory_space<vmem>>, vector<8x128xf32>
    tpu.vector_store %arg7[%c0_19, %c0_20], %50 {strides = array<i32>} : memref<8x128xf32, #tpu.memory_space<vmem>>, vector<8x128xf32>,
    return
  }
  func.func @transform_0(%arg0: i32) -> (i32, i32) {
    %c0_i32 = arith.constant 0 : i32
    %c0_i32_0 = arith.constant 0 : i32
    return %arg0, %c0_i32 : i32, i32
  }
  func.func @transform_1(%arg0: i32) -> (i32, i32) {
    %c0_i32 = arith.constant 0 : i32
    %c0_i32_0 = arith.constant 0 : i32
    %c0_i32_1 = arith.constant 0 : i32
    return %c0_i32, %c0_i32_0 : i32, i32
  }
  func.func @transform_2(%arg0: i32) -> (i32, i32) {
    %c0_i32 = arith.constant 0 : i32
    %c0_i32_0 = arith.constant 0 : i32
    %c0_i32_1 = arith.constant 0 : i32
    return %c0_i32, %c0_i32_0 : i32, i32
  }
  func.func @transform_3(%arg0: i32) -> (i32, i32) {
    %c0_i32 = arith.constant 0 : i32
    %c0_i32_0 = arith.constant 0 : i32
    return %arg0, %c0_i32 : i32, i32
  }
  func.func @transform_4(%arg0: i32) -> (i32, i32) {
    %c0_i32 = arith.constant 0 : i32
    %c0_i32_0 = arith.constant 0 : i32
    return %arg0, %c0_i32 : i32, i32
  }
  func.func @transform_5(%arg0: i32) -> (i32, i32) {
    %c0_i32 = arith.constant 0 : i32
    %c0_i32_0 = arith.constant 0 : i32
    return %arg0, %c0_i32 : i32, i32
  }
  func.func @transform_6(%arg0: i32) -> (i32, i32) {
    %c0_i32 = arith.constant 0 : i32
    %c0_i32_0 = arith.constant 0 : i32
    return %arg0, %c0_i32 : i32, i32
  }
}

</mosaic_0001>

<bundles_post_ra>
// kernel: tpu_custom_call.1
= control target key start
LH: loop header
LB: loop body
LE: loop exit
PB: predicated region body
PF: predicated region fallthrough
CT: control target
= control target key end

     0   :  { %12 = vsyncpa [#allocation3], 0  ;;  %vm51_vm0 = vcmask 523264   ;;  %s911_s0 = inlined_call_operand.vmem [shape: f32[32,64], index: 0, kind: input, shape index: {}]   ;;  %s912_s1 = inlined_call_operand.vmem [shape: f32[128,64], index: 1, kind: input, shape index: {}]   ;;  %s913_s2 = inlined_call_operand.vmem [shape: f32[1,128], index: 2, kind: input, shape index: {}]   ;;  %s914_s3 = inlined_call_operand.hbm [shape: f32[32,128], index: 3, kind: output, shape index: {0}]   ;;  %s915_s4 = inlined_call_operand.vmem [shape: s32[32,1], index: 4, kind: output, shape index: {1}]   ;;  %s916_s5 = inlined_call_operand.hbm [shape: f32[32,64], index: 5, kind: output, shape index: {2}]   ;;  %s917_s6 = inlined_call_operand.hbm [shape: f32[8,128], index: 6, kind: output, shape index: {3}]  }
   0x1   :  { %v25_v0 = vld [vmem:[%s912_s1] sm:$0xff]  ;;  %v26_v1 = vld [vmem:[%s912_s1 + $0x8] sm:$0xff]  ;;  %v27_v2 = vld [vmem:[%s912_s1 + $0x10] sm:$0xff] }
   0x2   :  { %v43_v3 = vpack.c.bf16 %v26_v1, %v25_v0  ;;  %v28_v4 = vld [vmem:[%s912_s1 + $0x18] sm:$0xff]  ;;  %v29_v7 = vld [vmem:[%s912_s1 + $0x20] sm:$0xff]  ;;  %v30_v8 = vld [vmem:[%s912_s1 + $0x28] sm:$0xff] }
   0x3   :  { %v44_v5 = vpack.c.bf16 %v28_v4, %v27_v2  ;;  %v724_v9 = vld [vmem:[%s911_s0] sm:$0xff]  ;;  %v729_v10 = vld [vmem:[%s911_s0 + $0x8] sm:$0xff] }
   0x4   :  { %571 = vmatprep.subr.msk.bf16.mxu0 %vm51_vm0, %v43_v3  ;;  %v59_v6 = vsel %vm51_vm0, %v43_v3, 0  ;;  %540 = vmatprep.subr.bf16.mxu1 %v43_v3  ;;  %v41_v11 = vpack.c.bf16 %v729_v10, %v724_v9 }
   0x5   :  { %482 = vmatpush3.bf16.xpose.msra.mxu0 %v59_v6  ;;  %542 = vmatpush3.bf16.msra.mxu1 %v43_v3 }
   0x6   :  { %572 = vmatprep.subr.msk.bf16.mxu0 %vm51_vm0, %v44_v5  ;;  %544 = vmatprep.subr.bf16.mxu1 %v44_v5 }
   0x7   :  { %13 = vsyncpa [#allocation5], 0  ;;  %v45_v12 = vpack.c.bf16 %v30_v8, %v29_v7  ;;  %v31_v13 = vld [vmem:[%s912_s1 + $0x30] sm:$0xff]  ;;  %v32_v14 = vld [vmem:[%s912_s1 + $0x38] sm:$0xff]  ;;  %497 = vmatprep.mubr.msk.bf16.mxu0 %vm51_vm0, %v41_v11  ;;  %v62_v15 = vsel %vm51_vm0, %v44_v5, 0  ;;  %v146_v51 = vlaneseq  ;;  %vm220_vm9 = vcmask 7168  }
   0x8   :  { %v46_v16 = vpack.c.bf16 %v32_v14, %v31_v13  ;;  %v33_v17 = vld [vmem:[%s912_s1 + $0x40] sm:$0xff]  ;;  %v34_v18 = vld [vmem:[%s912_s1 + $0x48] sm:$0xff]  ;;  %v35_v20 = vld [vmem:[%s912_s1 + $0x50] sm:$0xff] }
   0x9   :  { %546 = vmatpush3.bf16.msra.mxu1 %v44_v5  ;;  %v47_v19 = vpack.c.bf16 %v34_v18, %v33_v17  ;;  %v36_v21 = vld [vmem:[%s912_s1 + $0x58] sm:$0xff]  ;;  %v65_v22 = vsel %vm51_vm0, %v45_v12, 0  ;;  %v37_v24 = vld [vmem:[%s912_s1 + $0x60] sm:$0xff]  ;;  %v38_v25 = vld [vmem:[%s912_s1 + $0x68] sm:$0xff]  ;;  %v806_v52 = vand.u32 127, %v146_v51 }
   0xa   :  { %548 = vmatprep.subr.bf16.mxu1 %v45_v12  ;;  %v48_v23 = vpack.c.bf16 %v36_v21, %v35_v20  ;;  %v49_v26 = vpack.c.bf16 %v38_v25, %v37_v24  ;;  %v39_v27 = vld [vmem:[%s912_s1 + $0x70] sm:$0xff]  ;;  %v40_v28 = vld [vmem:[%s912_s1 + $0x78] sm:$0xff]  ;;  %v68_v29 = vsel %vm51_vm0, %v46_v16, 0  ;;  %v442_v39 = vld [vmem:[%s913_s2] ss:$0 sm:$0xff] }
   0xb   :  { %v50_v30 = vpack.c.bf16 %v40_v28, %v39_v27  ;;  %v71_v31 = vsel %vm51_vm0, %v47_v19, 0  ;;  %v780_v35 = vld [vmem:[%s911_s0 + $0x10] sm:$0xff]  ;;  %v785_v36 = vld [vmem:[%s911_s0 + $0x18] sm:$0xff] }
   0xc   :  { %v74_v32 = vsel %vm51_vm0, %v48_v23, 0  ;;  %v77_v33 = vsel %vm51_vm0, %v49_v26, 0  ;;  %v42_v37 = vpack.c.bf16 %v785_v36, %v780_v35  ;;  %v328_v25 = vmul.f32 %v780_v35, %v780_v35 }
   0xd   :  { %484 = vmatpush3.bf16.xpose.msra.mxu0 %v62_v15  ;;  %550 = vmatpush3.bf16.msra.mxu1 %v45_v12  ;;  %v80_v34 = vsel %vm51_vm0, %v50_v30, 0 }
   0xe   :  { %573 = vmatprep.subr.msk.bf16.mxu0 %vm51_vm0, %v45_v12  ;;  %552 = vmatprep.subr.bf16.mxu1 %v46_v16 }
  0x11   :  { %554 = vmatpush3.bf16.msra.mxu1 %v46_v16 }
  0x12   :  { %556 = vmatprep.subr.bf16.mxu1 %v47_v19 }
  0x15   :  { %486 = vmatpush3.bf16.xpose.msra.mxu0 %v65_v22  ;;  %558 = vmatpush3.bf16.msra.mxu1 %v47_v19  ;;  %v326_v22 = vmul.f32 %v724_v9, %v724_v9 }
  0x16   :  { %574 = vmatprep.subr.msk.bf16.mxu0 %vm51_vm0, %v46_v16  ;;  %560 = vmatprep.subr.bf16.mxu1 %v48_v23 }
  0x17   :  { %v330_v24 = vsel %vm51_vm0, %v326_v22, 0.0 }
  0x19   :  { %562 = vmatpush3.bf16.msra.mxu1 %v48_v23 }
  0x1a   :  { %564 = vmatprep.subr.bf16.mxu1 %v49_v26 }
  0x1d   :  { %488 = vmatpush3.bf16.xpose.msra.mxu0 %v68_v29  ;;  %566 = vmatpush3.bf16.msra.mxu1 %v49_v26 }
  0x1e   :  { %575 = vmatprep.subr.msk.bf16.mxu0 %vm51_vm0, %v47_v19  ;;  %568 = vmatprep.subr.bf16.mxu1 %v50_v30 }
  0x21   :  { %570 = vmatpush3.bf16.msra.mxu1 %v50_v30 }
  0x25   :  { %490 = vmatpush3.bf16.xpose.msra.mxu0 %v71_v31 }
  0x26   :  { %576 = vmatprep.subr.msk.bf16.mxu0 %vm51_vm0, %v48_v23 }
  0x2d   :  { %492 = vmatpush3.bf16.xpose.msra.mxu0 %v74_v32 }
  0x2e   :  { %577 = vmatprep.subr.msk.bf16.mxu0 %vm51_vm0, %v49_v26  ;;  %v336_v26 = vsel %vm51_vm0, %v328_v25, 0.0 }
  0x35   :  { %494 = vmatpush3.bf16.xpose.msra.mxu0 %v77_v33 }
  0x36   :  { %578 = vmatprep.subr.msk.bf16.mxu0 %vm51_vm0, %v50_v30 }
  0x3d   :  { %496 = vmatpush3.bf16.xpose.msra.mxu0 %v80_v34 }
  0x44   :  { %498 = vmatmul.mubr.msk.bf16.vlgmr.msra.gmra.mrb[0].mxu0 %vm51_vm0, %v42_v37 }
 0x117   :  { %v499_v38 = vpop.f32.mrb[0].mxu0 }
 0x118   :  { %v134_v40 = vmul.f32 2.0, %v499_v38  ;;  %v116_v41 = vpop.f32.mrb[1].mxu0 }
 0x119   :  { %v132_v42 = vmul.f32 2.0, %v116_v41  ;;  %v500_v43 = vpop.f32.mrb[2].mxu0 }
 0x11a   :  { %v793_v44 = vsub.f32 %v442_v39, %v134_v40  ;;  %v135_v45 = vmul.f32 2.0, %v500_v43  ;;  %v119_v46 = vpop.f32.mrb[3].mxu0  ;;  %v658_v43 = vmov 1.0  }
 0x11b   :  { %v795_v47 = vsub.f32 %v442_v39, %v132_v42  ;;  %v133_v48 = vmul.f32 2.0, %v119_v46 }
 0x11c   :  { %152 = vmin.xlane.f32.xlu1 %v793_v44  ;;  %v799_v49 = vsub.f32 %v442_v39, %v135_v45 }
 0x11d   :  { %148 = vmin.xlane.f32.xlu0 %v795_v47  ;;  %v801_v50 = vsub.f32 %v442_v39, %v133_v48 }
 0x120   :  { %154 = vmin.xlane.f32.xlu1 %v799_v49 }
 0x121   :  { %150 = vmin.xlane.f32.xlu0 %v801_v50 }
 0x1a9   :  { %v153_v53 = vpop.xlane.xlu1 %152 }
 0x1aa   :  { %vm158_vm1 = vcmp.eq.f32.partialorder %v793_v44, %v153_v53  ;;  %v149_v54 = vpop.xlane.xlu0 %148 }
 0x1ab   :  { %vm156_vm2 = vcmp.eq.f32.partialorder %v795_v47, %v149_v54  ;;  %v162_v55 = vsel %vm158_vm1, %v806_v52, 128 }
 0x1ac   :  { %v160_v56 = vsel %vm156_vm2, %v806_v52, 128  ;;  %v193_v61 = vshra.s32 %v162_v55, 16  ;;  %v192_v6 = vand.u32 65535, %v162_v55  ;;  %v659_v55 = vmov 0.0  }
 0x1ad   :  { %v155_v57 = vpop.xlane.xlu1 %154  ;;  %v165_v58 = vshra.s32 %v160_v56, 16  ;;  %v164_v5 = vand.u32 65535, %v160_v56 }
 0x1ae   :  { %vm159_vm3 = vcmp.eq.f32.partialorder %v799_v49, %v155_v57  ;;  %v151_v59 = vpop.xlane.xlu0 %150  ;;  %v195_v1 = vcvt.s32.f32 %v193_v61  ;;  %v194_v17 = vcvt.s32.f32 %v192_v6 }
 0x1af   :  { %vm157_vm4 = vcmp.eq.f32.partialorder %v801_v50, %v151_v59  ;;  %v167_v60 = vcvt.s32.f32 %v165_v58  ;;  %v163_v62 = vsel %vm159_vm3, %v806_v52, 128  ;;  %v166_v11 = vcvt.s32.f32 %v164_v5 }
 0x1b0   :  { %v161_v63 = vsel %vm157_vm4, %v806_v52, 128  ;;  %v207_v3 = vshra.s32 %v163_v62, 16  ;;  %v206_v13 = vand.u32 65535, %v163_v62 }
 0x1b1   :  { %168 = vmin.xlane.f32.xlu0 %v167_v60  ;;  %v179_v0 = vshra.s32 %v161_v63, 16  ;;  %v178_v7 = vand.u32 65535, %v161_v63 }
 0x1b2   :  { %v209_v4 = vcvt.s32.f32 %v207_v3  ;;  %v208_v21 = vcvt.s32.f32 %v206_v13 }
 0x1b3   :  { %v181_v2 = vcvt.s32.f32 %v179_v0  ;;  %v180_v16 = vcvt.s32.f32 %v178_v7 }
 0x1b5   :  { %196 = vmin.xlane.f32.xlu0 %v195_v1  ;;  %182 = vmin.xlane.f32.xlu1 %v181_v2 }
 0x1b9   :  { %210 = vmin.xlane.f32.xlu1 %v209_v4 }
 0x23e   :  { %v169_v8 = vpop.xlane.xlu0 %168 }
 0x23f   :  { %vm170_vm5 = vcmp.eq.f32.partialorder %v167_v60, %v169_v8  ;;  %v175_v27 = vcvt.f32.s32 %v169_v8 }
 0x240   :  { %v171_v12 = vsel %vm170_vm5, %v166_v11, inf }
 0x241   :  { %172 = vmin.xlane.f32.xlu0 %v171_v12  ;;  %v176_v31 = vshll.u32 %v175_v27, 16 }
 0x242   :  { %v183_v14 = vpop.xlane.xlu1 %182  ;;  %v197_v15 = vpop.xlane.xlu0 %196 }
 0x243   :  { %vm184_vm6 = vcmp.eq.f32.partialorder %v181_v2, %v183_v14  ;;  %vm198_vm7 = vcmp.eq.f32.partialorder %v195_v1, %v197_v15  ;;  %v189_v28 = vcvt.f32.s32 %v183_v14  ;;  %v203_v29 = vcvt.f32.s32 %v197_v15 }
 0x244   :  { %v185_v18 = vsel %vm184_vm6, %v180_v16, inf  ;;  %v199_v19 = vsel %vm198_vm7, %v194_v17, inf }
 0x245   :  { %186 = vmin.xlane.f32.xlu1 %v185_v18  ;;  %200 = vmin.xlane.f32.xlu0 %v199_v19  ;;  %v190_v34 = vshll.u32 %v189_v28, 16  ;;  %v204_v37 = vshll.u32 %v203_v29, 16 }
 0x246   :  { %v211_v20 = vpop.xlane.xlu1 %210 }
 0x247   :  { %vm212_vm8 = vcmp.eq.f32.partialorder %v209_v4, %v211_v20  ;;  %v217_v40 = vcvt.f32.s32 %v211_v20  ;;  %v327_v20 = vmul.f32 %v729_v10, %v729_v10 }
 0x248   :  { %v213_v23 = vsel %vm212_vm8, %v208_v21, inf }
 0x249   :  { %214 = vmin.xlane.f32.xlu1 %v213_v23  ;;  %v218_v53 = vshll.u32 %v217_v40, 16  ;;  %v333_v22 = vsel %vm51_vm0, %v327_v20, 0.0  ;;  %v329_v23 = vmul.f32 %v785_v36, %v785_v36 }
 0x24d   :  { %331 = vadd.xlane.f32.xlu1 %v330_v24 }
 0x251   :  { %337 = vadd.xlane.f32.xlu1 %v336_v26 }
 0x2ce   :  { %v173_v30 = vpop.xlane.xlu0 %172 }
 0x2cf   :  { %v174_v32 = vcvt.f32.s32 %v173_v30 }
 0x2d1   :  { %v177_v33 = vadd.s32 %v176_v31, %v174_v32 }
 0x2d2   :  { %v187_v38 = vpop.xlane.xlu1 %186  ;;  %v201_v39 = vpop.xlane.xlu0 %200 }
 0x2d3   :  { %v188_v41 = vcvt.f32.s32 %v187_v38  ;;  %v202_v42 = vcvt.f32.s32 %v201_v39  ;;  %221 = vst.msk [vmem:[%s915_s4] sm:$0xff] %vm220_vm9, %v177_v33  ;;  %vm225_vm10 = vcmp.eq.s32.totalorder %v806_v52, %v177_v33 }
 0x2d4   :  { %533 = vmatprep.mubr.msk.f32.mxu1 %vm225_vm10, %v658_v43  ;;  %v443_v56 = vsel %vm225_vm10, 1.0, %v659_v55 }
 0x2d5   :  { %v191_v45 = vadd.s32 %v190_v34, %v188_v41  ;;  %v205_v46 = vadd.s32 %v204_v37, %v202_v42 }
 0x2d6   :  { %v215_v48 = vpop.xlane.xlu1 %214 }
 0x2d7   :  { %222 = vst.msk [vmem:[%s915_s4 + $0x8] sm:$0xff] %vm220_vm9, %v191_v45  ;;  %223 = vst.msk [vmem:[%s915_s4 + $0x10] sm:$0xff] %vm220_vm9, %v205_v46  ;;  %vm226_vm11 = vcmp.eq.s32.totalorder %v806_v52, %v191_v45  ;;  %v216_v54 = vcvt.f32.s32 %v215_v48  ;;  %vm227_vm12 = vcmp.eq.s32.totalorder %v806_v52, %v205_v46 }
 0x2d8   :  { %v444_v57 = vsel %vm226_vm11, 1.0, %v659_v55  ;;  %534 = vmatmul.mubr.msk.f32.vlgmr.msra.gmra.mrb[0].mxu1 %vm226_vm11, %v658_v43  ;;  %v445_v60 = vsel %vm227_vm12, 1.0, %v659_v55 }
 0x2d9   :  { %v374_v58 = vadd.f32 %v444_v57, %v443_v56  ;;  %v219_v59 = vadd.s32 %v218_v53, %v216_v54  ;;  %536 = vmatprep.mubr.msk.f32.mxu1 %vm227_vm12, %v658_v43 }
 0x2da   :  { %v332_v61 = vpop.xlane.xlu1 %331 }
 0x2db   :  { %224 = vst.msk [vmem:[%s915_s4 + $0x18] sm:$0xff] %vm220_vm9, %v219_v59  ;;  %v375_v62 = vadd.f32 %v445_v60, %v374_v58  ;;  %v342_v63 = vadd.f32 %v332_v61, %v795_v47  ;;  %vm228_vm13 = vcmp.eq.s32.totalorder %v806_v52, %v219_v59  ;;  %s660_s4 = smov [#allocation4]  }
 0x2dc   :  { %v446_v0 = vsel %vm228_vm13, 1.0, %v659_v55  ;;  %537 = vmatmul.mubr.msk.f32.gmra.mrb[2].mxu1 %vm228_vm13, %v658_v43  ;;  %s410_s20 = sshll.u32 %s660_s4, 4  ;;  %s411_s20 = int_to_ptr.vmem [resolvable:$true] %s410_s20 }
 0x2dd   :  { %346 = vst [vmem:[#allocation2] sm:$0xff] %v342_v63  ;;  %v843_v1 = vadd.f32 %v446_v0, %v375_v62  ;;  %s588_s21 = scalar_lea.vmem %s411_s20, 512  ;;  %p593_p1 = scmp.lt.s32.totalorder %s411_s20, %s411_s20 }
 0x2de   :  { %v338_v2 = vpop.xlane.xlu1 %337  ;;  %p589_p0 = scmp.ne.s32.totalorder %s411_s20, %s588_s21  ;;  %p594_p2 = scmp.lt.s32.totalorder %s588_s21, %s588_s21 }
 0x2df   :  { %v344_v3 = vadd.f32 %v338_v2, %v793_v44 }
 0x2e0   :  { %p595_p3 = por %p594_p2, %p593_p1 }
 0x2e1   :  { %348 = vst [vmem:[#allocation2 + $0x10] sm:$0xff] %v344_v3 }
 0x2e2   :  { %p596_p4 = pnand %p595_p3, %p589_p0 }
 0x3ab   :  { %v535_v4 = vpop.f32.mrb[0].mxu1 }
 0x3ac   :  { %323 = vst.msk [vmem:[#allocation4 + $0x8] sm:$0xff] %vm51_vm0, %v535_v4  ;;  %v351_v5 = vsub.f32 %v535_v4, %v729_v10  ;;  %v303_v6 = vpop.f32.mrb[1].mxu1 }
 0x3ad   :  { %322 = vst.msk [vmem:[#allocation4] sm:$0xff] %vm51_vm0, %v303_v6  ;;  %v350_v47 = vsub.f32 %v303_v6, %v724_v9 }
 0x3ae   :  { %v355_v52 = vmul.f32 %v351_v5, %v351_v5 }
 0x3af   :  { %v354_v7 = vmul.f32 %v350_v47, %v350_v47  ;;  %v538_v8 = vpop.f32.mrb[2].mxu1 }
 0x3b0   :  { %v359_v11 = vsel %vm51_vm0, %v355_v52, 0.0  ;;  %325 = vst.msk [vmem:[#allocation4 + $0x18] sm:$0xff] %vm51_vm0, %v538_v8  ;;  %v353_v44 = vsub.f32 %v538_v8, %v785_v36  ;;  %v313_v12 = vpop.f32.mrb[3].mxu1 }
 0x3b1   :  { %v358_v13 = vsel %vm51_vm0, %v354_v7, 0.0  ;;  %324 = vst.msk [vmem:[#allocation4 + $0x10] sm:$0xff] %vm51_vm0, %v313_v12  ;;  %v352_v14 = vsub.f32 %v313_v12, %v780_v35  ;;  %v339_v35 = vsel %vm51_vm0, %v329_v23, 0.0 }
 0x3b2   :  { %v360_v15 = vadd.f32 %v359_v11, %v358_v13  ;;  %v357_v16 = vmul.f32 %v353_v44, %v353_v44 }
 0x3b3   :  { %v356_v17 = vmul.f32 %v352_v14, %v352_v14 }
 0x3b4   :  { %v363_v19 = vsel %vm51_vm0, %v357_v16, 0.0 }
 0x3b5   :  { %v361_v9 = vsel %vm51_vm0, %v356_v17, 0.0 }
 0x3b6   :  { %v362_v18 = vadd.f32 %v361_v9, %v360_v15 }
 0x3b8   :  { %v364_v21 = vadd.f32 %v363_v19, %v362_v18 }
 0x3ba   :  { %365 = vadd.xlane.f32.xlu0 %v364_v21 }
 0x3be   :  { %334 = vadd.xlane.f32.xlu0 %v333_v22 }
 0x3c2   :  { %340 = vadd.xlane.f32.xlu0 %v339_v35 }
 0x3c3   :  { %599 = shalt.err (!%p596_p4)
}
 0x3c4   :  { %s600_s24 = scalar_lea.hbm %s916_s5, 512 }
 0x3c5   :  { %p601_p5 = scmp.ne.s32.totalorder %s916_s5, %s600_s24  ;;  %p604_p6 = scmp.lt.u32.totalorder %s600_s24, %s916_s5 }
 0x3c7   :  { %p606_p7 = pnand %p604_p6, %p601_p5 }
 0x3c9   :  { %609 = shalt.err (!%p606_p7)
}
 0x3ca   :  { %s661_s29 = smov 128   ;;  %s662_s30 = smov 8  }
 0x3cb   :  { %416 = dma.vmem_to_hbm [thread:$0]  %s411_s20, 512, %s916_s5, [#allocation5], %s661_s29, %s661_s29, %s662_s30  }
 0x3cc   :  { %s663_s1 = smov [#allocation2]  }
 0x3cd   :  { %s396_s9 = sshll.u32 %s663_s1, 4  ;;  %s397_s9 = int_to_ptr.vmem [resolvable:$true] %s396_s9 }
 0x3ce   :  { %s610_s10 = scalar_lea.vmem %s397_s9, 512  ;;  %p615_p9 = scmp.lt.s32.totalorder %s397_s9, %s397_s9 }
 0x3cf   :  { %p611_p8 = scmp.ne.s32.totalorder %s397_s9, %s610_s10  ;;  %p616_p10 = scmp.lt.s32.totalorder %s610_s10, %s610_s10 }
 0x3d1   :  { %p617_p11 = por %p616_p10, %p615_p9 }
 0x3d3   :  { %p618_p12 = pnand %p617_p11, %p611_p8 }
 0x447   :  { %v366_v10 = vpop.xlane.xlu0 %365 }
 0x448   :  { %v367_v36 = vrot.slane %v366_v10, 4 }
 0x44a   :  { %v368_v24 = vadd.f32 %v367_v36, %v366_v10 }
 0x44b   :  { %v335_v25 = vpop.xlane.xlu0 %334 }
 0x44c   :  { %v369_v26 = vrot.slane %v368_v24, 2  ;;  %v343_v27 = vadd.f32 %v335_v25, %v801_v50 }
 0x44e   :  { %347 = vst [vmem:[#allocation2 + $0x8] sm:$0xff] %v343_v27  ;;  %v370_v28 = vadd.f32 %v369_v26, %v368_v24 }
 0x44f   :  { %v341_v29 = vpop.xlane.xlu0 %340 }
 0x450   :  { %v345_v30 = vadd.f32 %v341_v29, %v799_v49  ;;  %v371_v31 = vrot.slane %v370_v28, 1 }
 0x452   :  { %349 = vst [vmem:[#allocation2 + $0x18] sm:$0xff] %v345_v30  ;;  %v372_v32 = vadd.f32 %v371_v31, %v370_v28 }
 0x453   :  { %621 = shalt.err (!%p618_p12)
}
 0x454   :  { %s622_s12 = scalar_lea.hbm %s914_s3, 512 }
 0x455   :  { %p623_p13 = scmp.ne.s32.totalorder %s914_s3, %s622_s12  ;;  %p626_p0 = scmp.lt.u32.totalorder %s622_s12, %s914_s3 }
 0x457   :  { %p628_p1 = pnand %p626_p0, %p623_p13 }
 0x459   :  { %631 = shalt.err (!%p628_p1)
}
 0x45a   :  { %402 = dma.vmem_to_hbm [thread:$0]  %s397_s9, 512, %s914_s3, [#allocation3], %s661_s29, %s661_s29, %s662_s30   ;;  %579 = vpush %v372_v32  ;;  %v377_v49 = vrot.slane %v843_v1, 4  ;;  %v384_v37 = vshrl.u32 %v146_v51, 7 }
 0x45b   :  { %s664_s17 = smov [#allocation6]  }
 0x45c   :  { %v378_v50 = vadd.f32 %v377_v49, %v843_v1  ;;  %vm386_vm14 = vcmp.eq.s32.totalorder %v384_v37, 1  ;;  %s423_s18 = sshll.u32 %s664_s17, 4  ;;  %vm385_vm15 = vcmp.eq.s32.totalorder %v384_v37, 0  ;;  %s424_s18 = int_to_ptr.vmem [resolvable:$true] %s423_s18 }
 0x45d   :  { %s632_s3 = scalar_lea.vmem %s424_s18, 128  ;;  %p637_p3 = scmp.lt.s32.totalorder %s424_s18, %s424_s18 }
 0x45e   :  { %v379_v33 = vrot.slane %v378_v50, 2  ;;  %p633_p2 = scmp.ne.s32.totalorder %s424_s18, %s632_s3  ;;  %p638_p4 = scmp.lt.s32.totalorder %s632_s3, %s632_s3 }
 0x460   :  { %v380_v34 = vadd.f32 %v379_v33, %v378_v50  ;;  %p639_p5 = por %p638_p4, %p637_p3 }
 0x462   :  { %v381_v38 = vrot.slane %v380_v34, 1  ;;  %p640_p6 = pnand %p639_p5, %p633_p2 }
 0x464   :  { %v382_v40 = vadd.f32 %v381_v38, %v380_v34 }
 0x48b   :  { %s580_s19 = spop %579 }
 0x48c   :  { %v387_v39 = vstv %s580_s19 }
 0x48d   :  { %v388_v41 = vsel %vm386_vm14, %v387_v39, 0.0 }
 0x48e   :  { %v389_v42 = vsel %vm385_vm15, %v382_v40, %v388_v41 }
 0x48f   :  { %390 = vst [vmem:[#allocation6] sm:$0xff] %v389_v42 }
 0x490   :  { %643 = shalt.err (!%p640_p6)
}
 0x491   :  { %s644_s21 = scalar_lea.hbm %s917_s6, 128 }
 0x492   :  { %p645_p7 = scmp.ne.s32.totalorder %s917_s6, %s644_s21  ;;  %p648_p8 = scmp.lt.u32.totalorder %s644_s21, %s917_s6 }
 0x494   :  { %p650_p9 = pnand %p648_p8, %p645_p7 }
 0x496   :  { %653 = shalt.err (!%p650_p9)
}
 0x497   :  { %426 = dma.vmem_to_hbm [thread:$0]  %s424_s18, 128, %s917_s6, [#allocation5]  }
 0x498   :  { %654 = dma.done.wait [#allocation3], 512  }
 0x499   :  { %655 = vsyncadd [#allocation3], 4294966784 }
 0x49a   :  { %656 = dma.done.wait [#allocation5], 640  }
 0x49b   :  { %657 = vsyncadd [#allocation5], 4294966656 }
 0x49c   :  { %438 = vsyncpa [#allocation3], 1 }
 0x49d   :  { %439 = vsyncpa [#allocation5], 1 }

// kernel: tpu_custom_call.1
= control target key start
LH: loop header
LB: loop body
LE: loop exit
PB: predicated region body
PF: predicated region fallthrough
CT: control target
= control target key end

     0   :  { %12 = vsyncpa [#allocation3], 0  ;;  %vm51_vm0 = vcmask 523264   ;;  %s911_s0 = inlined_call_operand.vmem [shape: f32[32,64], index: 0, kind: input, shape index: {}]   ;;  %s912_s1 = inlined_call_operand.vmem [shape: f32[128,64], index: 1, kind: input, shape index: {}]   ;;  %s913_s2 = inlined_call_operand.vmem [shape: f32[1,128], index: 2, kind: input, shape index: {}]   ;;  %s914_s3 = inlined_call_operand.hbm [shape: f32[32,128], index: 3, kind: output, shape index: {0}]   ;;  %s915_s4 = inlined_call_operand.vmem [shape: s32[32,1], index: 4, kind: output, shape index: {1}]   ;;  %s916_s5 = inlined_call_operand.hbm [shape: f32[32,64], index: 5, kind: output, shape index: {2}]   ;;  %s917_s6 = inlined_call_operand.hbm [shape: f32[8,128], index: 6, kind: output, shape index: {3}]  }
   0x1   :  { %v25_v0 = vld [vmem:[%s912_s1] sm:$0xff]  ;;  %v26_v1 = vld [vmem:[%s912_s1 + $0x8] sm:$0xff]  ;;  %v27_v2 = vld [vmem:[%s912_s1 + $0x10] sm:$0xff] }
   0x2   :  { %v43_v3 = vpack.c.bf16 %v26_v1, %v25_v0  ;;  %v28_v4 = vld [vmem:[%s912_s1 + $0x18] sm:$0xff]  ;;  %v29_v7 = vld [vmem:[%s912_s1 + $0x20] sm:$0xff]  ;;  %v30_v8 = vld [vmem:[%s912_s1 + $0x28] sm:$0xff] }
   0x3   :  { %v44_v5 = vpack.c.bf16 %v28_v4, %v27_v2  ;;  %v724_v9 = vld [vmem:[%s911_s0] sm:$0xff]  ;;  %v729_v10 = vld [vmem:[%s911_s0 + $0x8] sm:$0xff] }
   0x4   :  { %571 = vmatprep.subr.msk.bf16.mxu0 %vm51_vm0, %v43_v3  ;;  %v59_v6 = vsel %vm51_vm0, %v43_v3, 0  ;;  %540 = vmatprep.subr.bf16.mxu1 %v43_v3  ;;  %v41_v11 = vpack.c.bf16 %v729_v10, %v724_v9 }
   0x5   :  { %482 = vmatpush3.bf16.xpose.msra.mxu0 %v59_v6  ;;  %542 = vmatpush3.bf16.msra.mxu1 %v43_v3 }
   0x6   :  { %572 = vmatprep.subr.msk.bf16.mxu0 %vm51_vm0, %v44_v5  ;;  %544 = vmatprep.subr.bf16.mxu1 %v44_v5 }
   0x7   :  { %13 = vsyncpa [#allocation5], 0  ;;  %v45_v12 = vpack.c.bf16 %v30_v8, %v29_v7  ;;  %v31_v13 = vld [vmem:[%s912_s1 + $0x30] sm:$0xff]  ;;  %v32_v14 = vld [vmem:[%s912_s1 + $0x38] sm:$0xff]  ;;  %497 = vmatprep.mubr.msk.bf16.mxu0 %vm51_vm0, %v41_v11  ;;  %v62_v15 = vsel %vm51_vm0, %v44_v5, 0  ;;  %v146_v51 = vlaneseq  ;;  %vm220_vm9 = vcmask 7168  }
   0x8   :  { %v46_v16 = vpack.c.bf16 %v32_v14, %v31_v13  ;;  %v33_v17 = vld [vmem:[%s912_s1 + $0x40] sm:$0xff]  ;;  %v34_v18 = vld [vmem:[%s912_s1 + $0x48] sm:$0xff]  ;;  %v35_v20 = vld [vmem:[%s912_s1 + $0x50] sm:$0xff] }
   0x9   :  { %546 = vmatpush3.bf16.msra.mxu1 %v44_v5  ;;  %v47_v19 = vpack.c.bf16 %v34_v18, %v33_v17  ;;  %v36_v21 = vld [vmem:[%s912_s1 + $0x58] sm:$0xff]  ;;  %v65_v22 = vsel %vm51_vm0, %v45_v12, 0  ;;  %v37_v24 = vld [vmem:[%s912_s1 + $0x60] sm:$0xff]  ;;  %v38_v25 = vld [vmem:[%s912_s1 + $0x68] sm:$0xff]  ;;  %v806_v52 = vand.u32 127, %v146_v51 }
   0xa   :  { %548 = vmatprep.subr.bf16.mxu1 %v45_v12  ;;  %v48_v23 = vpack.c.bf16 %v36_v21, %v35_v20  ;;  %v49_v26 = vpack.c.bf16 %v38_v25, %v37_v24  ;;  %v39_v27 = vld [vmem:[%s912_s1 + $0x70] sm:$0xff]  ;;  %v40_v28 = vld [vmem:[%s912_s1 + $0x78] sm:$0xff]  ;;  %v68_v29 = vsel %vm51_vm0, %v46_v16, 0  ;;  %v442_v39 = vld [vmem:[%s913_s2] ss:$0 sm:$0xff] }
   0xb   :  { %v50_v30 = vpack.c.bf16 %v40_v28, %v39_v27  ;;  %v71_v31 = vsel %vm51_vm0, %v47_v19, 0  ;;  %v780_v35 = vld [vmem:[%s911_s0 + $0x10] sm:$0xff]  ;;  %v785_v36 = vld [vmem:[%s911_s0 + $0x18] sm:$0xff] }
   0xc   :  { %v74_v32 = vsel %vm51_vm0, %v48_v23, 0  ;;  %v77_v33 = vsel %vm51_vm0, %v49_v26, 0  ;;  %v42_v37 = vpack.c.bf16 %v785_v36, %v780_v35  ;;  %v328_v25 = vmul.f32 %v780_v35, %v780_v35 }
   0xd   :  { %484 = vmatpush3.bf16.xpose.msra.mxu0 %v62_v15  ;;  %550 = vmatpush3.bf16.msra.mxu1 %v45_v12  ;;  %v80_v34 = vsel %vm51_vm0, %v50_v30, 0 }
   0xe   :  { %573 = vmatprep.subr.msk.bf16.mxu0 %vm51_vm0, %v45_v12  ;;  %552 = vmatprep.subr.bf16.mxu1 %v46_v16 }
  0x11   :  { %554 = vmatpush3.bf16.msra.mxu1 %v46_v16 }
  0x12   :  { %556 = vmatprep.subr.bf16.mxu1 %v47_v19 }
  0x15   :  { %486 = vmatpush3.bf16.xpose.msra.mxu0 %v65_v22  ;;  %558 = vmatpush3.bf16.msra.mxu1 %v47_v19  ;;  %v326_v22 = vmul.f32 %v724_v9, %v724_v9 }
  0x16   :  { %574 = vmatprep.subr.msk.bf16.mxu0 %vm51_vm0, %v46_v16  ;;  %560 = vmatprep.subr.bf16.mxu1 %v48_v23 }
  0x17   :  { %v330_v24 = vsel %vm51_vm0, %v326_v22, 0.0 }
  0x19   :  { %562 = vmatpush3.bf16.msra.mxu1 %v48_v23 }
  0x1a   :  { %564 = vmatprep.subr.bf16.mxu1 %v49_v26 }
  0x1d   :  { %488 = vmatpush3.bf16.xpose.msra.mxu0 %v68_v29  ;;  %566 = vmatpush3.bf16.msra.mxu1 %v49_v26 }
  0x1e   :  { %575 = vmatprep.subr.msk.bf16.mxu0 %vm51_vm0, %v47_v19  ;;  %568 = vmatprep.subr.bf16.mxu1 %v50_v30 }
  0x21   :  { %570 = vmatpush3.bf16.msra.mxu1 %v50_v30 }
  0x25   :  { %490 = vmatpush3.bf16.xpose.msra.mxu0 %v71_v31 }
  0x26   :  { %576 = vmatprep.subr.msk.bf16.mxu0 %vm51_vm0, %v48_v23 }
  0x2d   :  { %492 = vmatpush3.bf16.xpose.msra.mxu0 %v74_v32 }
  0x2e   :  { %577 = vmatprep.subr.msk.bf16.mxu0 %vm51_vm0, %v49_v26  ;;  %v336_v26 = vsel %vm51_vm0, %v328_v25, 0.0 }
  0x35   :  { %494 = vmatpush3.bf16.xpose.msra.mxu0 %v77_v33 }
  0x36   :  { %578 = vmatprep.subr.msk.bf16.mxu0 %vm51_vm0, %v50_v30 }
  0x3d   :  { %496 = vmatpush3.bf16.xpose.msra.mxu0 %v80_v34 }
  0x44   :  { %498 = vmatmul.mubr.msk.bf16.vlgmr.msra.gmra.mrb[0].mxu0 %vm51_vm0, %v42_v37 }
 0x117   :  { %v499_v38 = vpop.f32.mrb[0].mxu0 }
 0x118   :  { %v134_v40 = vmul.f32 2.0, %v499_v38  ;;  %v116_v41 = vpop.f32.mrb[1].mxu0 }
 0x119   :  { %v132_v42 = vmul.f32 2.0, %v116_v41  ;;  %v500_v43 = vpop.f32.mrb[2].mxu0 }
 0x11a   :  { %v793_v44 = vsub.f32 %v442_v39, %v134_v40  ;;  %v135_v45 = vmul.f32 2.0, %v500_v43  ;;  %v119_v46 = vpop.f32.mrb[3].mxu0  ;;  %v658_v43 = vmov 1.0  }
 0x11b   :  { %v795_v47 = vsub.f32 %v442_v39, %v132_v42  ;;  %v133_v48 = vmul.f32 2.0, %v119_v46 }
 0x11c   :  { %152 = vmin.xlane.f32.xlu1 %v793_v44  ;;  %v799_v49 = vsub.f32 %v442_v39, %v135_v45 }
 0x11d   :  { %148 = vmin.xlane.f32.xlu0 %v795_v47  ;;  %v801_v50 = vsub.f32 %v442_v39, %v133_v48 }
 0x120   :  { %154 = vmin.xlane.f32.xlu1 %v799_v49 }
 0x121   :  { %150 = vmin.xlane.f32.xlu0 %v801_v50 }
 0x1a9   :  { %v153_v53 = vpop.xlane.xlu1 %152 }
 0x1aa   :  { %vm158_vm1 = vcmp.eq.f32.partialorder %v793_v44, %v153_v53  ;;  %v149_v54 = vpop.xlane.xlu0 %148 }
 0x1ab   :  { %vm156_vm2 = vcmp.eq.f32.partialorder %v795_v47, %v149_v54  ;;  %v162_v55 = vsel %vm158_vm1, %v806_v52, 128 }
 0x1ac   :  { %v160_v56 = vsel %vm156_vm2, %v806_v52, 128  ;;  %v193_v61 = vshra.s32 %v162_v55, 16  ;;  %v192_v6 = vand.u32 65535, %v162_v55  ;;  %v659_v55 = vmov 0.0  }
 0x1ad   :  { %v155_v57 = vpop.xlane.xlu1 %154  ;;  %v165_v58 = vshra.s32 %v160_v56, 16  ;;  %v164_v5 = vand.u32 65535, %v160_v56 }
 0x1ae   :  { %vm159_vm3 = vcmp.eq.f32.partialorder %v799_v49, %v155_v57  ;;  %v151_v59 = vpop.xlane.xlu0 %150  ;;  %v195_v1 = vcvt.s32.f32 %v193_v61  ;;  %v194_v17 = vcvt.s32.f32 %v192_v6 }
 0x1af   :  { %vm157_vm4 = vcmp.eq.f32.partialorder %v801_v50, %v151_v59  ;;  %v167_v60 = vcvt.s32.f32 %v165_v58  ;;  %v163_v62 = vsel %vm159_vm3, %v806_v52, 128  ;;  %v166_v11 = vcvt.s32.f32 %v164_v5 }
 0x1b0   :  { %v161_v63 = vsel %vm157_vm4, %v806_v52, 128  ;;  %v207_v3 = vshra.s32 %v163_v62, 16  ;;  %v206_v13 = vand.u32 65535, %v163_v62 }
 0x1b1   :  { %168 = vmin.xlane.f32.xlu0 %v167_v60  ;;  %v179_v0 = vshra.s32 %v161_v63, 16  ;;  %v178_v7 = vand.u32 65535, %v161_v63 }
 0x1b2   :  { %v209_v4 = vcvt.s32.f32 %v207_v3  ;;  %v208_v21 = vcvt.s32.f32 %v206_v13 }
 0x1b3   :  { %v181_v2 = vcvt.s32.f32 %v179_v0  ;;  %v180_v16 = vcvt.s32.f32 %v178_v7 }
 0x1b5   :  { %196 = vmin.xlane.f32.xlu0 %v195_v1  ;;  %182 = vmin.xlane.f32.xlu1 %v181_v2 }
 0x1b9   :  { %210 = vmin.xlane.f32.xlu1 %v209_v4 }
 0x23e   :  { %v169_v8 = vpop.xlane.xlu0 %168 }
 0x23f   :  { %vm170_vm5 = vcmp.eq.f32.partialorder %v167_v60, %v169_v8  ;;  %v175_v27 = vcvt.f32.s32 %v169_v8 }
 0x240   :  { %v171_v12 = vsel %vm170_vm5, %v166_v11, inf }
 0x241   :  { %172 = vmin.xlane.f32.xlu0 %v171_v12  ;;  %v176_v31 = vshll.u32 %v175_v27, 16 }
 0x242   :  { %v183_v14 = vpop.xlane.xlu1 %182  ;;  %v197_v15 = vpop.xlane.xlu0 %196 }
 0x243   :  { %vm184_vm6 = vcmp.eq.f32.partialorder %v181_v2, %v183_v14  ;;  %vm198_vm7 = vcmp.eq.f32.partialorder %v195_v1, %v197_v15  ;;  %v189_v28 = vcvt.f32.s32 %v183_v14  ;;  %v203_v29 = vcvt.f32.s32 %v197_v15 }
 0x244   :  { %v185_v18 = vsel %vm184_vm6, %v180_v16, inf  ;;  %v199_v19 = vsel %vm198_vm7, %v194_v17, inf }
 0x245   :  { %186 = vmin.xlane.f32.xlu1 %v185_v18  ;;  %200 = vmin.xlane.f32.xlu0 %v199_v19  ;;  %v190_v34 = vshll.u32 %v189_v28, 16  ;;  %v204_v37 = vshll.u32 %v203_v29, 16 }
 0x246   :  { %v211_v20 = vpop.xlane.xlu1 %210 }
 0x247   :  { %vm212_vm8 = vcmp.eq.f32.partialorder %v209_v4, %v211_v20  ;;  %v217_v40 = vcvt.f32.s32 %v211_v20  ;;  %v327_v20 = vmul.f32 %v729_v10, %v729_v10 }
 0x248   :  { %v213_v23 = vsel %vm212_vm8, %v208_v21, inf }
 0x249   :  { %214 = vmin.xlane.f32.xlu1 %v213_v23  ;;  %v218_v53 = vshll.u32 %v217_v40, 16  ;;  %v333_v22 = vsel %vm51_vm0, %v327_v20, 0.0  ;;  %v329_v23 = vmul.f32 %v785_v36, %v785_v36 }
 0x24d   :  { %331 = vadd.xlane.f32.xlu1 %v330_v24 }
 0x251   :  { %337 = vadd.xlane.f32.xlu1 %v336_v26 }
 0x2ce   :  { %v173_v30 = vpop.xlane.xlu0 %172 }
 0x2cf   :  { %v174_v32 = vcvt.f32.s32 %v173_v30 }
 0x2d1   :  { %v177_v33 = vadd.s32 %v176_v31, %v174_v32 }
 0x2d2   :  { %v187_v38 = vpop.xlane.xlu1 %186  ;;  %v201_v39 = vpop.xlane.xlu0 %200 }
 0x2d3   :  { %v188_v41 = vcvt.f32.s32 %v187_v38  ;;  %v202_v42 = vcvt.f32.s32 %v201_v39  ;;  %221 = vst.msk [vmem:[%s915_s4] sm:$0xff] %vm220_vm9, %v177_v33  ;;  %vm225_vm10 = vcmp.eq.s32.totalorder %v806_v52, %v177_v33 }
 0x2d4   :  { %533 = vmatprep.mubr.msk.f32.mxu1 %vm225_vm10, %v658_v43  ;;  %v443_v56 = vsel %vm225_vm10, 1.0, %v659_v55 }
 0x2d5   :  { %v191_v45 = vadd.s32 %v190_v34, %v188_v41  ;;  %v205_v46 = vadd.s32 %v204_v37, %v202_v42 }
 0x2d6   :  { %v215_v48 = vpop.xlane.xlu1 %214 }
 0x2d7   :  { %222 = vst.msk [vmem:[%s915_s4 + $0x8] sm:$0xff] %vm220_vm9, %v191_v45  ;;  %223 = vst.msk [vmem:[%s915_s4 + $0x10] sm:$0xff] %vm220_vm9, %v205_v46  ;;  %vm226_vm11 = vcmp.eq.s32.totalorder %v806_v52, %v191_v45  ;;  %v216_v54 = vcvt.f32.s32 %v215_v48  ;;  %vm227_vm12 = vcmp.eq.s32.totalorder %v806_v52, %v205_v46 }
 0x2d8   :  { %v444_v57 = vsel %vm226_vm11, 1.0, %v659_v55  ;;  %534 = vmatmul.mubr.msk.f32.vlgmr.msra.gmra.mrb[0].mxu1 %vm226_vm11, %v658_v43  ;;  %v445_v60 = vsel %vm227_vm12, 1.0, %v659_v55 }
 0x2d9   :  { %v374_v58 = vadd.f32 %v444_v57, %v443_v56  ;;  %v219_v59 = vadd.s32 %v218_v53, %v216_v54  ;;  %536 = vmatprep.mubr.msk.f32.mxu1 %vm227_vm12, %v658_v43 }
 0x2da   :  { %v332_v61 = vpop.xlane.xlu1 %331 }
 0x2db   :  { %224 = vst.msk [vmem:[%s915_s4 + $0x18] sm:$0xff] %vm220_vm9, %v219_v59  ;;  %v375_v62 = vadd.f32 %v445_v60, %v374_v58  ;;  %v342_v63 = vadd.f32 %v332_v61, %v795_v47  ;;  %vm228_vm13 = vcmp.eq.s32.totalorder %v806_v52, %v219_v59  ;;  %s660_s4 = smov [#allocation4]  }
 0x2dc   :  { %v446_v0 = vsel %vm228_vm13, 1.0, %v659_v55  ;;  %537 = vmatmul.mubr.msk.f32.gmra.mrb[2].mxu1 %vm228_vm13, %v658_v43  ;;  %s410_s20 = sshll.u32 %s660_s4, 4  ;;  %s411_s20 = int_to_ptr.vmem [resolvable:$true] %s410_s20 }
 0x2dd   :  { %346 = vst [vmem:[#allocation2] sm:$0xff] %v342_v63  ;;  %v843_v1 = vadd.f32 %v446_v0, %v375_v62  ;;  %s588_s21 = scalar_lea.vmem %s411_s20, 512  ;;  %p593_p1 = scmp.lt.s32.totalorder %s411_s20, %s411_s20 }
 0x2de   :  { %v338_v2 = vpop.xlane.xlu1 %337  ;;  %p589_p0 = scmp.ne.s32.totalorder %s411_s20, %s588_s21  ;;  %p594_p2 = scmp.lt.s32.totalorder %s588_s21, %s588_s21 }
 0x2df   :  { %v344_v3 = vadd.f32 %v338_v2, %v793_v44 }
 0x2e0   :  { %p595_p3 = por %p594_p2, %p593_p1 }
 0x2e1   :  { %348 = vst [vmem:[#allocation2 + $0x10] sm:$0xff] %v344_v3 }
 0x2e2   :  { %p596_p4 = pnand %p595_p3, %p589_p0 }
 0x3ab   :  { %v535_v4 = vpop.f32.mrb[0].mxu1 }
 0x3ac   :  { %323 = vst.msk [vmem:[#allocation4 + $0x8] sm:$0xff] %vm51_vm0, %v535_v4  ;;  %v351_v5 = vsub.f32 %v535_v4, %v729_v10  ;;  %v303_v6 = vpop.f32.mrb[1].mxu1 }
 0x3ad   :  { %322 = vst.msk [vmem:[#allocation4] sm:$0xff] %vm51_vm0, %v303_v6  ;;  %v350_v47 = vsub.f32 %v303_v6, %v724_v9 }
 0x3ae   :  { %v355_v52 = vmul.f32 %v351_v5, %v351_v5 }
 0x3af   :  { %v354_v7 = vmul.f32 %v350_v47, %v350_v47  ;;  %v538_v8 = vpop.f32.mrb[2].mxu1 }
 0x3b0   :  { %v359_v11 = vsel %vm51_vm0, %v355_v52, 0.0  ;;  %325 = vst.msk [vmem:[#allocation4 + $0x18] sm:$0xff] %vm51_vm0, %v538_v8  ;;  %v353_v44 = vsub.f32 %v538_v8, %v785_v36  ;;  %v313_v12 = vpop.f32.mrb[3].mxu1 }
 0x3b1   :  { %v358_v13 = vsel %vm51_vm0, %v354_v7, 0.0  ;;  %324 = vst.msk [vmem:[#allocation4 + $0x10] sm:$0xff] %vm51_vm0, %v313_v12  ;;  %v352_v14 = vsub.f32 %v313_v12, %v780_v35  ;;  %v339_v35 = vsel %vm51_vm0, %v329_v23, 0.0 }
 0x3b2   :  { %v360_v15 = vadd.f32 %v359_v11, %v358_v13  ;;  %v357_v16 = vmul.f32 %v353_v44, %v353_v44 }
 0x3b3   :  { %v356_v17 = vmul.f32 %v352_v14, %v352_v14 }
 0x3b4   :  { %v363_v19 = vsel %vm51_vm0, %v357_v16, 0.0 }
 0x3b5   :  { %v361_v9 = vsel %vm51_vm0, %v356_v17, 0.0 }
 0x3b6   :  { %v362_v18 = vadd.f32 %v361_v9, %v360_v15 }
 0x3b8   :  { %v364_v21 = vadd.f32 %v363_v19, %v362_v18 }
 0x3ba   :  { %365 = vadd.xlane.f32.xlu0 %v364_v21 }
 0x3be   :  { %334 = vadd.xlane.f32.xlu0 %v333_v22 }
 0x3c2   :  { %340 = vadd.xlane.f32.xlu0 %v339_v35 }
 0x3c3   :  { %599 = shalt.err (!%p596_p4)
}
 0x3c4   :  { %s600_s24 = scalar_lea.hbm %s916_s5, 512 }
 0x3c5   :  { %p601_p5 = scmp.ne.s32.totalorder %s916_s5, %s600_s24  ;;  %p604_p6 = scmp.lt.u32.totalorder %s600_s24, %s916_s5 }
 0x3c7   :  { %p606_p7 = pnand %p604_p6, %p601_p5 }
 0x3c9   :  { %609 = shalt.err (!%p606_p7)
}
 0x3ca   :  { %s661_s29 = smov 128   ;;  %s662_s30 = smov 8  }
 0x3cb   :  { %416 = dma.vmem_to_hbm [thread:$0]  %s411_s20, 512, %s916_s5, [#allocation5], %s661_s29, %s661_s29, %s662_s30  }
 0x3cc   :  { %s663_s1 = smov [#allocation2]  }
 0x3cd   :  { %s396_s9 = sshll.u32 %s663_s1, 4  ;;  %s397_s9 = int_to_ptr.vmem [resolvable:$true] %s396_s9 }
 0x3ce   :  { %s610_s10 = scalar_lea.vmem %s397_s9, 512  ;;  %p615_p9 = scmp.lt.s32.totalorder %s397_s9, %s397_s9 }
 0x3cf   :  { %p611_p8 = scmp.ne.s32.totalorder %s397_s9, %s610_s10  ;;  %p616_p10 = scmp.lt.s32.totalorder %s610_s10, %s610_s10 }
 0x3d1   :  { %p617_p11 = por %p616_p10, %p615_p9 }
 0x3d3   :  { %p618_p12 = pnand %p617_p11, %p611_p8 }
 0x447   :  { %v366_v10 = vpop.xlane.xlu0 %365 }
 0x448   :  { %v367_v36 = vrot.slane %v366_v10, 4 }
 0x44a   :  { %v368_v24 = vadd.f32 %v367_v36, %v366_v10 }
 0x44b   :  { %v335_v25 = vpop.xlane.xlu0 %334 }
 0x44c   :  { %v369_v26 = vrot.slane %v368_v24, 2  ;;  %v343_v27 = vadd.f32 %v335_v25, %v801_v50 }
 0x44e   :  { %347 = vst [vmem:[#allocation2 + $0x8] sm:$0xff] %v343_v27  ;;  %v370_v28 = vadd.f32 %v369_v26, %v368_v24 }
 0x44f   :  { %v341_v29 = vpop.xlane.xlu0 %340 }
 0x450   :  { %v345_v30 = vadd.f32 %v341_v29, %v799_v49  ;;  %v371_v31 = vrot.slane %v370_v28, 1 }
 0x452   :  { %349 = vst [vmem:[#allocation2 + $0x18] sm:$0xff] %v345_v30  ;;  %v372_v32 = vadd.f32 %v371_v31, %v370_v28 }
 0x453   :  { %621 = shalt.err (!%p618_p12)
}
 0x454   :  { %s622_s12 = scalar_lea.hbm %s914_s3, 512 }
 0x455   :  { %p623_p13 = scmp.ne.s32.totalorder %s914_s3, %s622_s12  ;;  %p626_p0 = scmp.lt.u32.totalorder %s622_s12, %s914_s3 }
 0x457   :  { %p628_p1 = pnand %p626_p0, %p623_p13 }
 0x459   :  { %631 = shalt.err (!%p628_p1)
}
 0x45a   :  { %402 = dma.vmem_to_hbm [thread:$0]  %s397_s9, 512, %s914_s3, [#allocation3], %s661_s29, %s661_s29, %s662_s30   ;;  %579 = vpush %v372_v32  ;;  %v377_v49 = vrot.slane %v843_v1, 4  ;;  %v384_v37 = vshrl.u32 %v146_v51, 7 }
 0x45b   :  { %s664_s17 = smov [#allocation6]  }
 0x45c   :  { %v378_v50 = vadd.f32 %v377_v49, %v843_v1  ;;  %vm386_vm14 = vcmp.eq.s32.totalorder %v384_v37, 1  ;;  %s423_s18 = sshll.u32 %s664_s17, 4  ;;  %vm385_vm15 = vcmp.eq.s32.totalorder %v384_v37, 0  ;;  %s424_s18 = int_to_ptr.vmem [resolvable:$true] %s423_s18 }
 0x45d   :  { %s632_s3 = scalar_lea.vmem %s424_s18, 128  ;;  %p637_p3 = scmp.lt.s32.totalorder %s424_s18, %s424_s18 }
 0x45e   :  { %v379_v33 = vrot.slane %v378_v50, 2  ;;  %p633_p2 = scmp.ne.s32.totalorder %s424_s18, %s632_s3  ;;  %p638_p4 = scmp.lt.s32.totalorder %s632_s3, %s632_s3 }
 0x460   :  { %v380_v34 = vadd.f32 %v379_v33, %v378_v50  ;;  %p639_p5 = por %p638_p4, %p637_p3 }
 0x462   :  { %v381_v38 = vrot.slane %v380_v34, 1  ;;  %p640_p6 = pnand %p639_p5, %p633_p2 }
 0x464   :  { %v382_v40 = vadd.f32 %v381_v38, %v380_v34 }
 0x48b   :  { %s580_s19 = spop %579 }
 0x48c   :  { %v387_v39 = vstv %s580_s19 }
 0x48d   :  { %v388_v41 = vsel %vm386_vm14, %v387_v39, 0.0 }
 0x48e   :  { %v389_v42 = vsel %vm385_vm15, %v382_v40, %v388_v41 }
 0x48f   :  { %390 = vst [vmem:[#allocation6] sm:$0xff] %v389_v42 }
 0x490   :  { %643 = shalt.err (!%p640_p6)
}
 0x491   :  { %s644_s21 = scalar_lea.hbm %s917_s6, 128 }
 0x492   :  { %p645_p7 = scmp.ne.s32.totalorder %s917_s6, %s644_s21  ;;  %p648_p8 = scmp.lt.u32.totalorder %s644_s21, %s917_s6 }
 0x494   :  { %p650_p9 = pnand %p648_p8, %p645_p7 }
 0x496   :  { %653 = shalt.err (!%p650_p9)
}
 0x497   :  { %426 = dma.vmem_to_hbm [thread:$0]  %s424_s18, 128, %s917_s6, [#allocation5]  }
 0x498   :  { %654 = dma.done.wait [#allocation3], 512  }
 0x499   :  { %655 = vsyncadd [#allocation3], 4294966784 }
 0x49a   :  { %656 = dma.done.wait [#allocation5], 640  }
 0x49b   :  { %657 = vsyncadd [#allocation5], 4294966656 }
 0x49c   :  { %438 = vsyncpa [#allocation3], 1 }
 0x49d   :  { %439 = vsyncpa [#allocation5], 1 }

</bundles_post_ra>
